<compile_context>
chip_gen: v6e
topology: v6e:2x2x1
jax: 0.10.0
libtpu: 0.0.40
codegen_flags: <defaults>
</compile_context>

<pallas_src>
import functools

import jax
import jax.numpy as jnp
from jax.experimental import pallas as pl
from jax.experimental.pallas import tpu as pltpu

KH = KW = 3      # 3x3 conv, padding=1, stride=1
LANE = 128       # TPU lane width


def _shortcut_conv_kernel(x_ref, w_ref, b_ref, m_ref, out_ref, patch_ref, *, H, W):
    """Fused 3x3 conv (padding=1) + bias + residual over G whole images.

    x_ref    : (C, T)      T = G*H*W flat lanes (G whole images, lane-dense)
    w_ref    : (C, Kpad)   weight columns = (kh*KW + kw)*C + ci, zero-padded
    b_ref    : (C, 1)      bias (sublane column, broadcast along lanes)
    m_ref    : (8, T)      in-bounds masks for the 8 non-center taps (1/0)
    out_ref  : (C, T)
    patch_ref: (Kpad, T)   VMEM scratch holding the im2col patch matrix
    """
    C, T = x_ref.shape
    Kpad = patch_ref.shape[0]
    K = KH * KW * C

    x = x_ref[...]                               # input dtype; no MXU-operand upcast

    # Zero the K-padding rows once; the scratch persists across grid steps and
    # the tap rows below are fully overwritten every step.
    if Kpad > K:
        @pl.when(pl.program_id(0) == 0)
        def _():
            patch_ref[pl.ds(K, Kpad - K), :] = jnp.zeros(
                (Kpad - K, T), dtype=patch_ref.dtype)

    zero = jnp.zeros_like(x)
    m = 0
    for kh in range(KH):
        dh = kh - 1
        for kw in range(KW):
            dw = kw - 1
            s = dh * W + dw                      # flat source offset of this tap
            row = (kh * KW + kw) * C
            if s == 0:
                patch_ref[pl.ds(row, C), :] = x
            else:
                shifted = pltpu.roll(x, (-s) % T, axis=1)           # XLU slot
                mask = jnp.broadcast_to(m_ref[m:m + 1, :], x.shape)
                patch_ref[pl.ds(row, C), :] = jnp.where(mask != 0, shifted, zero)
                m += 1

    # Single fused matmul over all taps / input channels, f32 accumulation.
    conv = jnp.dot(w_ref[...], patch_ref[...],
                   preferred_element_type=jnp.float32)              # (C, T) f32

    bias = b_ref[...].astype(jnp.float32)                           # (C, 1)
    out_ref[...] = (x.astype(jnp.float32) + conv + bias).astype(out_ref.dtype)


def pack_conv_params(w_oihw, b):
    """One-off repack: OIHW -> (Cout, Kpad), column = (kh*KW + kw)*Cin + ci."""
    Cout, Cin, kh, kw = w_oihw.shape
    assert (kh, kw) == (KH, KW) and Cout == Cin
    K = KH * KW * Cin
    Kpad = ((K + LANE - 1) // LANE) * LANE
    w_mat = jnp.transpose(w_oihw, (0, 2, 3, 1)).reshape(Cout, K)
    w_mat = jnp.pad(w_mat, ((0, 0), (0, Kpad - K)))
    b_col = b.reshape(Cout, 1)
    return w_mat, b_col


def _tap_masks(H, W, G, dtype):
    """(8, G*H*W) in-bounds masks (1.0/0.0) for the 8 non-center taps."""
    h = jnp.arange(H, dtype=jnp.int32)[:, None]
    w = jnp.arange(W, dtype=jnp.int32)[None, :]
    rows = []
    for kh in range(KH):
        dh = kh - 1
        for kw in range(KW):
            dw = kw - 1
            if dh == 0 and dw == 0:
                continue
            ok = ((h + dh >= 0) & (h + dh < H) & (w + dw >= 0) & (w + dw < W))
            rows.append(ok.reshape(-1))
    m = jnp.stack(rows, axis=0).astype(dtype)      # (8, H*W)
    return jnp.tile(m, (1, G))                     # (8, G*H*W)


def _pick_group(N, HW, lane_budget=4096):
    """Largest divisor of N whose group of whole images fits the lane budget."""
    best = 1
    for g in range(1, N + 1):
        if N % g == 0 and g * HW <= max(lane_budget, HW):
            best = g
    return best


def _vmem_limit_bytes():
    try:
        cap = pltpu.get_tpu_info().vmem_capacity_bytes
    except Exception:
        cap = 64 * 1024 * 1024
    # Leave headroom: v5e/v6e (128 MiB) get up to ~96 MiB, v7x (64 MiB) ~48 MiB.
    return int(min(cap * 3 // 4, 96 * 1024 * 1024))


def shortcut_block(x_nchw, w_mat, b_col):
    """out = x + Conv2d_3x3(x, padding=1, bias).  NCHW in / NCHW out."""
    N, C, H, W = x_nchw.shape
    HW = H * W
    G = _pick_group(N, HW)
    T = G * HW
    Kpad = w_mat.shape[1]

    # Batch fused onto the lane axis: (N, C, H, W) -> (C, N*H*W).
    x_flat = jnp.transpose(x_nchw.reshape(N, C, HW), (1, 0, 2)).reshape(C, N * HW)
    masks = _tap_masks(H, W, G, x_nchw.dtype)

    kernel = functools.partial(_shortcut_conv_kernel, H=H, W=W)
    out_flat = pl.pallas_call(
        kernel,
        out_shape=jax.ShapeDtypeStruct((C, N * HW), x_nchw.dtype),
        grid=(N // G,),
        in_specs=[
            pl.BlockSpec((C, T), lambda i: (0, i)),
            pl.BlockSpec((C, Kpad), lambda i: (0, 0)),
            pl.BlockSpec((C, 1), lambda i: (0, 0)),
            pl.BlockSpec((8, T), lambda i: (0, 0)),
        ],
        out_specs=pl.BlockSpec((C, T), lambda i: (0, i)),
        scratch_shapes=[pltpu.VMEM((Kpad, T), x_nchw.dtype)],
        compiler_params=pltpu.CompilerParams(
            dimension_semantics=("parallel",),
            vmem_limit_bytes=_vmem_limit_bytes()),
    )(x_flat, w_mat.astype(x_nchw.dtype), b_col.astype(x_nchw.dtype), masks)

    # TODO(synk): for SR-scale single images (9*C*HW*dtype beyond the VMEM
    # budget, esp. v7x's 64 MiB) tile the flat axis in 128-multiple chunks with
    # a +/-W halo (pl.ANY + make_async_copy) and, for large C on v7x, switch to
    # 9 accumulated (C,C)@(C,tile) matmuls into an f32 scratch instead of im2col.
    return out_flat.reshape(C, N, HW).transpose(1, 0, 2).reshape(N, C, H, W)


def _reference(x_nchw, w_oihw, b):
    """Pure-JAX reference: x + Conv2d(x, 3x3, padding=1, bias)."""
    conv = jax.lax.conv_general_dilated(
        x_nchw, w_oihw, window_strides=(1, 1), padding="SAME",
        dimension_numbers=("NCHW", "OIHW", "NCHW"))
    return x_nchw + conv + b.reshape(1, -1, 1, 1)


if __name__ == "__main__":
    key = jax.random.PRNGKey(0)
    k_x, k_w, k_b = jax.random.split(key, 3)

    N, C, H, W = 2, 8, 16, 16
    x = jax.random.normal(k_x, (N, C, H, W), dtype=jnp.float32)
    # Deterministic synthetic conv parameters (no checkpoint load).
    w = 0.1 * jax.random.normal(k_w, (C, C, KH, KW), dtype=jnp.float32)  # OIHW
    b = 0.1 * jax.random.normal(k_b, (C,), dtype=jnp.float32)

    w_mat, b_col = pack_conv_params(w, b)      # hoisted one-off weight repack
    fwd = jax.jit(shortcut_block)

    out = fwd(x, w_mat, b_col)
    out = jax.block_until_ready(out)

    ref = _reference(x, w, b)
    assert out.shape == ref.shape
    assert jnp.allclose(out, ref, atol=1e-4, rtol=1e-4), "mismatch vs reference"

    print("KERNEL_OK")
</pallas_src>

<mosaic_0001>
module attributes {stable_mosaic.version = 11 : i64} {
  func.func @_shortcut_conv_kernel(%arg0: i32, %arg1: memref<8x512xf32, #tpu.memory_space<vmem>>, %arg2: memref<8x128xf32, #tpu.memory_space<vmem>>, %arg3: memref<8x1xf32, #tpu.memory_space<vmem>>, %arg4: memref<8x512xf32, #tpu.memory_space<vmem>>, %arg5: memref<8x512xf32, #tpu.memory_space<vmem>>, %arg6: memref<128x512xf32, #tpu.memory_space<vmem>>) attributes {dimension_semantics = [#tpu.dimension_semantics<parallel>], iteration_bounds = array<i64: 1>, scalar_prefetch = 0 : i64, scratch_operands = 1 : i64, tpu.core_type = #tpu.core_type<tc>, window_params = [{transform_indices = @transform_0, window_bounds = array<i64: 8, 512>}, {pipeline_mode = #tpu.pipeline_mode<synchronous>, transform_indices = @transform_1, window_bounds = array<i64: 8, 128>}, {pipeline_mode = #tpu.pipeline_mode<synchronous>, transform_indices = @transform_2, window_bounds = array<i64: 8, 1>}, {pipeline_mode = #tpu.pipeline_mode<synchronous>, transform_indices = @transform_3, window_bounds = array<i64: 8, 512>}, {transform_indices = @transform_4, window_bounds = array<i64: 8, 512>}]} {
    %c0 = arith.constant 0 : index
    %c0_0 = arith.constant 0 : index
    %0 = vector.load %arg1[%c0, %c0_0] : memref<8x512xf32, #tpu.memory_space<vmem>>, vector<8x512xf32>
    %c0_i32 = arith.constant 0 : i32
    %1 = arith.cmpi eq, %arg0, %c0_i32 : i32
    %2 = arith.extui %1 : i1 to i32
    %c0_i32_1 = arith.constant 0 : i32
    %3 = arith.cmpi ne, %2, %c0_i32_1 : i32
    scf.if %3 {
      %cst_38 = arith.constant 0.000000e+00 : f32
      %78 = vector.broadcast %cst_38 : f32 to vector<56x512xf32>
      %c72 = arith.constant 72 : index
      %c0_39 = arith.constant 0 : index
      %79 = vector.load %arg6[%c72, %c0_39] : memref<128x512xf32, #tpu.memory_space<vmem>>, vector<56x512xf32>
      tpu.vector_store %arg6[%c72, %c0_39], %78 {strides = array<i32>} : memref<128x512xf32, #tpu.memory_space<vmem>>, vector<56x512xf32>,
    } else {
    }
    %cst = arith.constant 0.000000e+00 : f32
    %4 = vector.broadcast %cst : f32 to vector<8x512xf32>
    %c17_i32 = arith.constant 17 : i32
    %5 = tpu.dynamic_rotate %0 by %c17_i32 dim 1 : vector<8x512xf32>, i32 -> vector<8x512xf32>
    %c0_2 = arith.constant 0 : index
    %c0_3 = arith.constant 0 : index
    %6 = vector.load %arg4[%c0_2, %c0_3] : memref<8x512xf32, #tpu.memory_space<vmem>>, vector<1x512xf32>
    %7 = vector.shape_cast %6 : vector<1x512xf32> to vector<1x512xf32>
    %8 = vector.broadcast %7 : vector<1x512xf32> to vector<8x512xf32>
    %cst_4 = arith.constant 0.000000e+00 : f32
    %9 = vector.broadcast %cst_4 : f32 to vector<8x512xf32>
    %10 = arith.cmpf one, %8, %9 : vector<8x512xf32>
    %11 = arith.select %10, %5, %4 : vector<8x512xi1>, vector<8x512xf32>
    %c0_5 = arith.constant 0 : index
    %c0_6 = arith.constant 0 : index
    %12 = vector.load %arg6[%c0_5, %c0_6] : memref<128x512xf32, #tpu.memory_space<vmem>>, vector<8x512xf32>
    tpu.vector_store %arg6[%c0_5, %c0_6], %11 {strides = array<i32>} : memref<128x512xf32, #tpu.memory_space<vmem>>, vector<8x512xf32>,
    %c16_i32 = arith.constant 16 : i32
    %13 = tpu.dynamic_rotate %0 by %c16_i32 dim 1 : vector<8x512xf32>, i32 -> vector<8x512xf32>
    %c1 = arith.constant 1 : index
    %c0_7 = arith.constant 0 : index
    %14 = vector.load %arg4[%c1, %c0_7] : memref<8x512xf32, #tpu.memory_space<vmem>>, vector<1x512xf32>
    %15 = vector.shape_cast %14 : vector<1x512xf32> to vector<1x512xf32>
    %16 = vector.broadcast %15 : vector<1x512xf32> to vector<8x512xf32>
    %cst_8 = arith.constant 0.000000e+00 : f32
    %17 = vector.broadcast %cst_8 : f32 to vector<8x512xf32>
    %18 = arith.cmpf one, %16, %17 : vector<8x512xf32>
    %19 = arith.select %18, %13, %4 : vector<8x512xi1>, vector<8x512xf32>
    %c8 = arith.constant 8 : index
    %c0_9 = arith.constant 0 : index
    %20 = vector.load %arg6[%c8, %c0_9] : memref<128x512xf32, #tpu.memory_space<vmem>>, vector<8x512xf32>
    tpu.vector_store %arg6[%c8, %c0_9], %19 {strides = array<i32>} : memref<128x512xf32, #tpu.memory_space<vmem>>, vector<8x512xf32>,
    %c15_i32 = arith.constant 15 : i32
    %21 = tpu.dynamic_rotate %0 by %c15_i32 dim 1 : vector<8x512xf32>, i32 -> vector<8x512xf32>
    %c2 = arith.constant 2 : index
    %c0_10 = arith.constant 0 : index
    %22 = vector.load %arg4[%c2, %c0_10] : memref<8x512xf32, #tpu.memory_space<vmem>>, vector<1x512xf32>
    %23 = vector.shape_cast %22 : vector<1x512xf32> to vector<1x512xf32>
    %24 = vector.broadcast %23 : vector<1x512xf32> to vector<8x512xf32>
    %cst_11 = arith.constant 0.000000e+00 : f32
    %25 = vector.broadcast %cst_11 : f32 to vector<8x512xf32>
    %26 = arith.cmpf one, %24, %25 : vector<8x512xf32>
    %27 = arith.select %26, %21, %4 : vector<8x512xi1>, vector<8x512xf32>
    %c16 = arith.constant 16 : index
    %c0_12 = arith.constant 0 : index
    %28 = vector.load %arg6[%c16, %c0_12] : memref<128x512xf32, #tpu.memory_space<vmem>>, vector<8x512xf32>
    tpu.vector_store %arg6[%c16, %c0_12], %27 {strides = array<i32>} : memref<128x512xf32, #tpu.memory_space<vmem>>, vector<8x512xf32>,
    %c1_i32 = arith.constant 1 : i32
    %29 = tpu.dynamic_rotate %0 by %c1_i32 dim 1 : vector<8x512xf32>, i32 -> vector<8x512xf32>
    %c3 = arith.constant 3 : index
    %c0_13 = arith.constant 0 : index
    %30 = vector.load %arg4[%c3, %c0_13] : memref<8x512xf32, #tpu.memory_space<vmem>>, vector<1x512xf32>
    %31 = vector.shape_cast %30 : vector<1x512xf32> to vector<1x512xf32>
    %32 = vector.broadcast %31 : vector<1x512xf32> to vector<8x512xf32>
    %cst_14 = arith.constant 0.000000e+00 : f32
    %33 = vector.broadcast %cst_14 : f32 to vector<8x512xf32>
    %34 = arith.cmpf one, %32, %33 : vector<8x512xf32>
    %35 = arith.select %34, %29, %4 : vector<8x512xi1>, vector<8x512xf32>
    %c24 = arith.constant 24 : index
    %c0_15 = arith.constant 0 : index
    %36 = vector.load %arg6[%c24, %c0_15] : memref<128x512xf32, #tpu.memory_space<vmem>>, vector<8x512xf32>
    tpu.vector_store %arg6[%c24, %c0_15], %35 {strides = array<i32>} : memref<128x512xf32, #tpu.memory_space<vmem>>, vector<8x512xf32>,
    %c32 = arith.constant 32 : index
    %c0_16 = arith.constant 0 : index
    %37 = vector.load %arg6[%c32, %c0_16] : memref<128x512xf32, #tpu.memory_space<vmem>>, vector<8x512xf32>
    tpu.vector_store %arg6[%c32, %c0_16], %0 {strides = array<i32>} : memref<128x512xf32, #tpu.memory_space<vmem>>, vector<8x512xf32>,
    %c511_i32 = arith.constant 511 : i32
    %38 = tpu.dynamic_rotate %0 by %c511_i32 dim 1 : vector<8x512xf32>, i32 -> vector<8x512xf32>
    %c4 = arith.constant 4 : index
    %c0_17 = arith.constant 0 : index
    %39 = vector.load %arg4[%c4, %c0_17] : memref<8x512xf32, #tpu.memory_space<vmem>>, vector<1x512xf32>
    %40 = vector.shape_cast %39 : vector<1x512xf32> to vector<1x512xf32>
    %41 = vector.broadcast %40 : vector<1x512xf32> to vector<8x512xf32>
    %cst_18 = arith.constant 0.000000e+00 : f32
    %42 = vector.broadcast %cst_18 : f32 to vector<8x512xf32>
    %43 = arith.cmpf one, %41, %42 : vector<8x512xf32>
    %44 = arith.select %43, %38, %4 : vector<8x512xi1>, vector<8x512xf32>
    %c40 = arith.constant 40 : index
    %c0_19 = arith.constant 0 : index
    %45 = vector.load %arg6[%c40, %c0_19] : memref<128x512xf32, #tpu.memory_space<vmem>>, vector<8x512xf32>
    tpu.vector_store %arg6[%c40, %c0_19], %44 {strides = array<i32>} : memref<128x512xf32, #tpu.memory_space<vmem>>, vector<8x512xf32>,
    %c497_i32 = arith.constant 497 : i32
    %46 = tpu.dynamic_rotate %0 by %c497_i32 dim 1 : vector<8x512xf32>, i32 -> vector<8x512xf32>
    %c5 = arith.constant 5 : index
    %c0_20 = arith.constant 0 : index
    %47 = vector.load %arg4[%c5, %c0_20] : memref<8x512xf32, #tpu.memory_space<vmem>>, vector<1x512xf32>
    %48 = vector.shape_cast %47 : vector<1x512xf32> to vector<1x512xf32>
    %49 = vector.broadcast %48 : vector<1x512xf32> to vector<8x512xf32>
    %cst_21 = arith.constant 0.000000e+00 : f32
    %50 = vector.broadcast %cst_21 : f32 to vector<8x512xf32>
    %51 = arith.cmpf one, %49, %50 : vector<8x512xf32>
    %52 = arith.select %51, %46, %4 : vector<8x512xi1>, vector<8x512xf32>
    %c48 = arith.constant 48 : index
    %c0_22 = arith.constant 0 : index
    %53 = vector.load %arg6[%c48, %c0_22] : memref<128x512xf32, #tpu.memory_space<vmem>>, vector<8x512xf32>
    tpu.vector_store %arg6[%c48, %c0_22], %52 {strides = array<i32>} : memref<128x512xf32, #tpu.memory_space<vmem>>, vector<8x512xf32>,
    %c496_i32 = arith.constant 496 : i32
    %54 = tpu.dynamic_rotate %0 by %c496_i32 dim 1 : vector<8x512xf32>, i32 -> vector<8x512xf32>
    %c6 = arith.constant 6 : index
    %c0_23 = arith.constant 0 : index
    %55 = vector.load %arg4[%c6, %c0_23] : memref<8x512xf32, #tpu.memory_space<vmem>>, vector<1x512xf32>
    %56 = vector.shape_cast %55 : vector<1x512xf32> to vector<1x512xf32>
    %57 = vector.broadcast %56 : vector<1x512xf32> to vector<8x512xf32>
    %cst_24 = arith.constant 0.000000e+00 : f32
    %58 = vector.broadcast %cst_24 : f32 to vector<8x512xf32>
    %59 = arith.cmpf one, %57, %58 : vector<8x512xf32>
    %60 = arith.select %59, %54, %4 : vector<8x512xi1>, vector<8x512xf32>
    %c56 = arith.constant 56 : index
    %c0_25 = arith.constant 0 : index
    %61 = vector.load %arg6[%c56, %c0_25] : memref<128x512xf32, #tpu.memory_space<vmem>>, vector<8x512xf32>
    tpu.vector_store %arg6[%c56, %c0_25], %60 {strides = array<i32>} : memref<128x512xf32, #tpu.memory_space<vmem>>, vector<8x512xf32>,
    %c495_i32 = arith.constant 495 : i32
    %62 = tpu.dynamic_rotate %0 by %c495_i32 dim 1 : vector<8x512xf32>, i32 -> vector<8x512xf32>
    %c7 = arith.constant 7 : index
    %c0_26 = arith.constant 0 : index
    %63 = vector.load %arg4[%c7, %c0_26] : memref<8x512xf32, #tpu.memory_space<vmem>>, vector<1x512xf32>
    %64 = vector.shape_cast %63 : vector<1x512xf32> to vector<1x512xf32>
    %65 = vector.broadcast %64 : vector<1x512xf32> to vector<8x512xf32>
    %cst_27 = arith.constant 0.000000e+00 : f32
    %66 = vector.broadcast %cst_27 : f32 to vector<8x512xf32>
    %67 = arith.cmpf one, %65, %66 : vector<8x512xf32>
    %68 = arith.select %67, %62, %4 : vector<8x512xi1>, vector<8x512xf32>
    %c64 = arith.constant 64 : index
    %c0_28 = arith.constant 0 : index
    %69 = vector.load %arg6[%c64, %c0_28] : memref<128x512xf32, #tpu.memory_space<vmem>>, vector<8x512xf32>
    tpu.vector_store %arg6[%c64, %c0_28], %68 {strides = array<i32>} : memref<128x512xf32, #tpu.memory_space<vmem>>, vector<8x512xf32>,
    %c0_29 = arith.constant 0 : index
    %c0_30 = arith.constant 0 : index
    %70 = vector.load %arg2[%c0_29, %c0_30] : memref<8x128xf32, #tpu.memory_space<vmem>>, vector<8x128xf32>
    %c0_31 = arith.constant 0 : index
    %c0_32 = arith.constant 0 : index
    %71 = vector.load %arg6[%c0_31, %c0_32] : memref<128x512xf32, #tpu.memory_space<vmem>>, vector<128x512xf32>
    %cst_33 = arith.constant dense<0.000000e+00> : vector<8x512xf32>
    %72 = tpu.matmul %70, %71, %cst_33 {dimension_numbers = #tpu.dot_dimension_numbers<[1], [0], [0], [1], [0, 0, 1, 1], [], []>} : vector<8x128xf32>, vector<128x512xf32>, vector<8x512xf32> -> vector<8x512xf32>
    %c0_34 = arith.constant 0 : index
    %c0_35 = arith.constant 0 : index
    %73 = vector.load %arg3[%c0_34, %c0_35] : memref<8x1xf32, #tpu.memory_space<vmem>>, vector<8x1xf32>
    %74 = arith.addf %0, %72 : vector<8x512xf32>
    %75 = vector.broadcast %73 : vector<8x1xf32> to vector<8x512xf32>
    %76 = arith.addf %74, %75 : vector<8x512xf32>
    %c0_36 = arith.constant 0 : index
    %c0_37 = arith.constant 0 : index
    %77 = vector.load %arg5[%c0_36, %c0_37] : memref<8x512xf32, #tpu.memory_space<vmem>>, vector<8x512xf32>
    tpu.vector_store %arg5[%c0_36, %c0_37], %76 {strides = array<i32>} : memref<8x512xf32, #tpu.memory_space<vmem>>, vector<8x512xf32>,
    return
  }
  func.func @transform_0(%arg0: i32) -> (i32, i32) {
    %c0_i32 = arith.constant 0 : i32
    %c0_i32_0 = arith.constant 0 : i32
    return %c0_i32, %arg0 : i32, i32
  }
  func.func @transform_1(%arg0: i32) -> (i32, i32) {
    %c0_i32 = arith.constant 0 : i32
    %c0_i32_0 = arith.constant 0 : i32
    %c0_i32_1 = arith.constant 0 : i32
    return %c0_i32, %c0_i32_0 : i32, i32
  }
  func.func @transform_2(%arg0: i32) -> (i32, i32) {
    %c0_i32 = arith.constant 0 : i32
    %c0_i32_0 = arith.constant 0 : i32
    %c0_i32_1 = arith.constant 0 : i32
    return %c0_i32, %c0_i32_0 : i32, i32
  }
  func.func @transform_3(%arg0: i32) -> (i32, i32) {
    %c0_i32 = arith.constant 0 : i32
    %c0_i32_0 = arith.constant 0 : i32
    %c0_i32_1 = arith.constant 0 : i32
    return %c0_i32, %c0_i32_0 : i32, i32
  }
  func.func @transform_4(%arg0: i32) -> (i32, i32) {
    %c0_i32 = arith.constant 0 : i32
    %c0_i32_0 = arith.constant 0 : i32
    return %c0_i32, %arg0 : i32, i32
  }
}

</mosaic_0001>

<bundles_post_ra>
// kernel: shortcut_block.1
= control target key start
LH: loop header
LB: loop body
LE: loop exit
PB: predicated region body
PF: predicated region fallthrough
CT: control target
= control target key end

     0   :  { %s721_s19 = smov 111   ;;  %s722_s24 = smov 112   ;;  %v728_v4 = vmov 0.0   ;;  %v729_v5 = vmov 0   ;;  %v61_v7 = vlaneseq  ;;  %s940_s0 = inlined_call_operand.vmem [shape: f32[8,512], index: 0, kind: input, shape index: {}]   ;;  %s941_s2 = inlined_call_operand.vmem [shape: f32[8,1], index: 2, kind: input, shape index: {}]   ;;  %s942_s3 = inlined_call_operand.vmem [shape: f32[8,512], index: 3, kind: input, shape index: {}]   ;;  %s943_s1 = inlined_call_operand.vmem [shape: f32[8,128], index: 1, kind: input, shape index: {}]   ;;  %s944_s4 = inlined_call_operand.vmem [shape: f32[8,512], index: 4, kind: output, shape index: {}]  }
   0x1   :  { %v759_v0 = vld [vmem:[%s940_s0 + $0x10] sm:$0xff]  ;;  %v764_v1 = vld [vmem:[%s940_s0] sm:$0xff]  ;;  %v771_v2 = vld [vmem:[%s940_s0 + $0x18] sm:$0xff]  ;;  %s723_s25 = smov 113   ;;  %s725_s26 = smov 1   ;;  %571 = vmatprep.mubr.f32.mxu0 %v728_v4  ;;  %642 = vmatprep.mubr.f32.mxu1 %v728_v4 }
   0x2   :  { %398 = vrot.lane.b32.xlu1 %v759_v0, %s721_s19  ;;  %394 = vrot.lane.b32.xlu0 %v764_v1, %s721_s19  ;;  %v776_v3 = vld [vmem:[%s940_s0 + $0x8] sm:$0xff]  ;;  %s724_s0 = smov 127   ;;  %s726_s27 = smov 15   ;;  %v649_v6 = vld [vmem:[%s941_s2] sm:$0xff]  ;;  %v71_v8 = vshrl.u32 %v61_v7, 7  ;;  %v822_v14 = vand.u32 127, %v61_v7 }
   0x3   :  { %s727_s28 = smov 16   ;;  %720 = vset.pattern.permute.xlu0 %v729_v5  ;;  %s730_s29 = smov 17   ;;  %v677_v11 = vld [vmem:[%s942_s3 + $0x7] ss:$8 sm:$0xf] }
   0x4   :  { %v811_v9 = vsub.s32 1, %v71_v8  ;;  %v813_v10 = vsub.s32 3, %v71_v8  ;;  %v818_v12 = vsub.s32 0, %v71_v8  ;;  %v820_v13 = vsub.s32 2, %v71_v8 }
   0x5   :  { %vm402_vm0 = vcmp.lt.s32.totalorder %v822_v14, 111  ;;  %v676_v23 = vld [vmem:[%s942_s3 + $0x6] ss:$8 sm:$0xf]  ;;  %vm354_vm5 = vcmp.lt.s32.totalorder %v822_v14, 112  ;;  %vm306_vm10 = vcmp.lt.s32.totalorder %v822_v14, 113 }
   0x6   :  { %400 = vrot.lane.b32.xlu1 %v771_v2, %s721_s19  ;;  %396 = vrot.lane.b32.xlu0 %v776_v3, %s721_s19  ;;  %v417_v15 = vrot.slane %v677_v11, %v811_v9  ;;  %v425_v16 = vrot.slane %v677_v11, %v813_v10  ;;  %v413_v19 = vrot.slane %v677_v11, %v818_v12  ;;  %v675_v36 = vld [vmem:[%s942_s3 + $0x5] ss:$8 sm:$0xf]  ;;  %v674_v49 = vld [vmem:[%s942_s3 + $0x4] ss:$8 sm:$0xf] }
   0x7   :  { %v421_v20 = vrot.slane %v677_v11, %v820_v13  ;;  %v369_v28 = vrot.slane %v676_v23, %v811_v9  ;;  %v377_v29 = vrot.slane %v676_v23, %v813_v10  ;;  %v365_v32 = vrot.slane %v676_v23, %v818_v12  ;;  %v673_v60 = vld [vmem:[%s942_s3 + $0x3] ss:$8 sm:$0xf] }
   0x8   :  { %vm431_vm1 = vcmp.ne.f32.partialorder %v417_v15, 0.0  ;;  %vm433_vm2 = vcmp.ne.f32.partialorder %v425_v16, 0.0  ;;  %vm430_vm3 = vcmp.ne.f32.partialorder %v413_v19, 0.0  ;;  %v373_v33 = vrot.slane %v676_v23, %v820_v13 }
   0x9   :  { %vm432_vm4 = vcmp.ne.f32.partialorder %v421_v20, 0.0  ;;  %vm383_vm6 = vcmp.ne.f32.partialorder %v369_v28, 0.0  ;;  %vm385_vm7 = vcmp.ne.f32.partialorder %v377_v29, 0.0  ;;  %vm382_vm8 = vcmp.ne.f32.partialorder %v365_v32, 0.0 }
   0xa   :  { %348 = vrot.lane.b32.xlu1 %v776_v3, %s722_s24  ;;  %346 = vrot.lane.b32.xlu0 %v764_v1, %s722_s24  ;;  %vm384_vm9 = vcmp.ne.f32.partialorder %v373_v33, 0.0  ;;  %v321_v41 = vrot.slane %v675_v36, %v811_v9  ;;  %v329_v42 = vrot.slane %v675_v36, %v813_v10  ;;  %v317_v45 = vrot.slane %v675_v36, %v818_v12 }
   0xb   :  { %v325_v46 = vrot.slane %v675_v36, %v820_v13  ;;  %v273_v54 = vrot.slane %v674_v49, %v811_v9  ;;  %v281_v55 = vrot.slane %v674_v49, %v813_v10  ;;  %v269_v58 = vrot.slane %v674_v49, %v818_v12 }
   0xc   :  { %vm335_vm11 = vcmp.ne.f32.partialorder %v321_v41, 0.0  ;;  %vm337_vm12 = vcmp.ne.f32.partialorder %v329_v42, 0.0  ;;  %vm334_vm13 = vcmp.ne.f32.partialorder %v317_v45, 0.0  ;;  %v277_v59 = vrot.slane %v674_v49, %v820_v13 }
   0xd   :  { %vm336_vm14 = vcmp.ne.f32.partialorder %v325_v46, 0.0  ;;  %vm258_vm15 = vcmp.lt.s32.totalorder %v822_v14, 127  ;;  %v221_v61 = vrot.slane %v673_v60, %v811_v9  ;;  %v217_v8 = vrot.slane %v673_v60, %v818_v12 }
   0xe   :  { %352 = vrot.lane.b32.xlu1 %v771_v2, %s722_s24  ;;  %350 = vrot.lane.b32.xlu0 %v759_v0, %s722_s24  ;;  %v229_v11 = vrot.slane %v673_v60, %v813_v10 }
  0x12   :  { %300 = vrot.lane.b32.xlu1 %v776_v3, %s723_s25  ;;  %298 = vrot.lane.b32.xlu0 %v764_v1, %s723_s25 }
  0x16   :  { %304 = vrot.lane.b32.xlu1 %v771_v2, %s723_s25  ;;  %302 = vrot.lane.b32.xlu0 %v759_v0, %s723_s25 }
  0x1a   :  { %252 = vrot.lane.b32.xlu1 %v776_v3, %s724_s0  ;;  %250 = vrot.lane.b32.xlu0 %v764_v1, %s724_s0 }
  0x1e   :  { %256 = vrot.lane.b32.xlu1 %v771_v2, %s724_s0  ;;  %254 = vrot.lane.b32.xlu0 %v759_v0, %s724_s0 }
  0x22   :  { %200 = vrot.lane.b32.xlu1 %v776_v3, %s725_s26  ;;  %198 = vrot.lane.b32.xlu0 %v764_v1, %s725_s26 }
  0x26   :  { %204 = vrot.lane.b32.xlu1 %v771_v2, %s725_s26  ;;  %202 = vrot.lane.b32.xlu0 %v759_v0, %s725_s26 }
  0x2a   :  { %152 = vrot.lane.b32.xlu1 %v776_v3, %s726_s27  ;;  %150 = vrot.lane.b32.xlu0 %v764_v1, %s726_s27 }
  0x2e   :  { %156 = vrot.lane.b32.xlu1 %v771_v2, %s726_s27  ;;  %154 = vrot.lane.b32.xlu0 %v759_v0, %s726_s27 }
  0x32   :  { %104 = vrot.lane.b32.xlu1 %v776_v3, %s727_s28  ;;  %102 = vrot.lane.b32.xlu0 %v764_v1, %s727_s28 }
  0x36   :  { %108 = vrot.lane.b32.xlu1 %v771_v2, %s727_s28  ;;  %106 = vrot.lane.b32.xlu0 %v759_v0, %s727_s28 }
  0x3a   :  { %55 = vrot.lane.b32.xlu1 %v776_v3, %s730_s29  ;;  %53 = vrot.lane.b32.xlu0 %v764_v1, %s730_s29 }
  0x3e   :  { %59 = vrot.lane.b32.xlu1 %v771_v2, %s730_s29  ;;  %57 = vrot.lane.b32.xlu0 %v759_v0, %s730_s29 }
  0x42   :  { %656 = vperm.xlu0 %720, %v649_v6  }
  0x74   :  { %v399_v17 = vpop.permute.xlu1 %398  ;;  %v395_v18 = vpop.permute.xlu0 %394 }
  0x78   :  { %v401_v21 = vpop.permute.xlu1 %400  ;;  %v397_v22 = vpop.permute.xlu0 %396 }
  0x79   :  { %v404_v24 = vsel %vm402_vm0, %v397_v22, %v399_v17  ;;  %v406_v25 = vsel %vm402_vm0, %v401_v21, %v395_v18  ;;  %v405_v26 = vsel %vm402_vm0, %v395_v18, %v397_v22  ;;  %v403_v27 = vsel %vm402_vm0, %v399_v17, %v401_v21  ;;  %v672_v18 = vld [vmem:[%s942_s3 + $0x2] ss:$8 sm:$0xf] }
  0x7a   :  { %678 = vmatprep.subr.msk.mxu0 %vm431_vm1, %v404_v24  ;;  %694 = vmatprep.subr.msk.mxu1 %vm433_vm2, %v406_v25  ;;  %vm287_vm0 = vcmp.ne.f32.partialorder %v273_v54, 0.0  ;;  %vm289_vm1 = vcmp.ne.f32.partialorder %v281_v55, 0.0  ;;  %vm286_vm2 = vcmp.ne.f32.partialorder %v269_v58, 0.0  ;;  %v225_v17 = vrot.slane %v673_v60, %v820_v13 }
  0x7b   :  { %679 = vmatpush1.msk.msra.mxu0 %vm430_vm3, %v405_v26  ;;  %695 = vmatpush1.msk.msra.mxu1 %vm432_vm4, %v403_v27  ;;  %vm288_vm3 = vcmp.ne.f32.partialorder %v277_v59, 0.0  ;;  %vm206_vm4 = vcmp.lt.s32.totalorder %v822_v14, 1  ;;  %v173_v20 = vrot.slane %v672_v18, %v811_v9  ;;  %v169_v26 = vrot.slane %v672_v18, %v818_v12  ;;  %v442_v59 = vld [vmem:[%s943_s1] sm:$0xff] }
  0x7c   :  { %v349_v30 = vpop.permute.xlu1 %348  ;;  %v347_v31 = vpop.permute.xlu0 %346  ;;  %v181_v27 = vrot.slane %v672_v18, %v813_v10 }
  0x7d   :  { %v357_v40 = vsel %vm354_vm5, %v347_v31, %v349_v30 }
  0x80   :  { %v353_v34 = vpop.permute.xlu1 %352  ;;  %v351_v35 = vpop.permute.xlu0 %350 }
  0x81   :  { %v358_v37 = vsel %vm354_vm5, %v353_v34, %v347_v31  ;;  %v355_v38 = vsel %vm354_vm5, %v351_v35, %v353_v34  ;;  %v356_v39 = vsel %vm354_vm5, %v349_v30, %v351_v35  ;;  %vm235_vm5 = vcmp.ne.f32.partialorder %v221_v61, 0.0  ;;  %v671_v31 = vld [vmem:[%s942_s3 + $0x1] ss:$8 sm:$0xf] }
  0x82   :  { %680 = vmatprep.subr.msk.mxu0 %vm383_vm6, %v356_v39  ;;  %696 = vmatprep.subr.msk.mxu1 %vm385_vm7, %v358_v37  ;;  %vm234_vm6 = vcmp.ne.f32.partialorder %v217_v8, 0.0  ;;  %vm237_vm7 = vcmp.ne.f32.partialorder %v229_v11, 0.0  ;;  %v177_v30 = vrot.slane %v672_v18, %v820_v13  ;;  %v125_v33 = vrot.slane %v671_v31, %v811_v9 }
  0x83   :  { %681 = vmatpush1.msk.msra.mxu0 %vm382_vm8, %v357_v40  ;;  %697 = vmatpush1.msk.msra.mxu1 %vm384_vm9, %v355_v38  ;;  %vm236_vm8 = vcmp.ne.f32.partialorder %v225_v17, 0.0  ;;  %vm158_vm9 = vcmp.lt.s32.totalorder %v822_v14, 15  ;;  %v121_v39 = vrot.slane %v671_v31, %v818_v12  ;;  %v133_v40 = vrot.slane %v671_v31, %v813_v10 }
  0x84   :  { %v301_v43 = vpop.permute.xlu1 %300  ;;  %v299_v44 = vpop.permute.xlu0 %298 }
  0x85   :  { %v309_v53 = vsel %vm306_vm10, %v299_v44, %v301_v43 }
  0x88   :  { %v305_v47 = vpop.permute.xlu1 %304  ;;  %v303_v48 = vpop.permute.xlu0 %302 }
  0x89   :  { %v310_v50 = vsel %vm306_vm10, %v305_v47, %v299_v44  ;;  %v307_v51 = vsel %vm306_vm10, %v303_v48, %v305_v47  ;;  %v308_v52 = vsel %vm306_vm10, %v301_v43, %v303_v48  ;;  %vm187_vm10 = vcmp.ne.f32.partialorder %v173_v20, 0.0  ;;  %v68_v44 = vld [vmem:[%s942_s3] ss:$8 sm:$0xf] }
  0x8a   :  { %682 = vmatprep.subr.msk.mxu0 %vm335_vm11, %v308_v52  ;;  %698 = vmatprep.subr.msk.mxu1 %vm337_vm12, %v310_v50  ;;  %vm186_vm11 = vcmp.ne.f32.partialorder %v169_v26, 0.0  ;;  %vm189_vm12 = vcmp.ne.f32.partialorder %v181_v27, 0.0  ;;  %v129_v43 = vrot.slane %v671_v31, %v820_v13  ;;  %v77_v46 = vrot.slane %v68_v44, %v811_v9 }
  0x8b   :  { %683 = vmatpush1.msk.msra.mxu0 %vm334_vm13, %v309_v53  ;;  %699 = vmatpush1.msk.msra.mxu1 %vm336_vm14, %v307_v51  ;;  %vm188_vm13 = vcmp.ne.f32.partialorder %v177_v30, 0.0  ;;  %vm110_vm14 = vcmp.lt.s32.totalorder %v822_v14, 16  ;;  %v73_v9 = vrot.slane %v68_v44, %v818_v12  ;;  %v85_v52 = vrot.slane %v68_v44, %v813_v10 }
  0x8c   :  { %v253_v56 = vpop.permute.xlu1 %252  ;;  %v251_v57 = vpop.permute.xlu0 %250  ;;  %v81_v55 = vrot.slane %v68_v44, %v820_v13 }
  0x8d   :  { %v261_v7 = vsel %vm258_vm15, %v251_v57, %v253_v56 }
  0x90   :  { %v257_v62 = vpop.permute.xlu1 %256  ;;  %v255_v63 = vpop.permute.xlu0 %254 }
  0x91   :  { %v262_v4 = vsel %vm258_vm15, %v257_v62, %v251_v57  ;;  %v259_v5 = vsel %vm258_vm15, %v255_v63, %v257_v62  ;;  %v260_v6 = vsel %vm258_vm15, %v253_v56, %v255_v63  ;;  %vm139_vm15 = vcmp.ne.f32.partialorder %v125_v33, 0.0 }
  0x92   :  { %684 = vmatprep.subr.msk.mxu0 %vm287_vm0, %v260_v6  ;;  %700 = vmatprep.subr.msk.mxu1 %vm289_vm1, %v262_v4  ;;  %vm138_vm0 = vcmp.ne.f32.partialorder %v121_v39, 0.0  ;;  %vm141_vm1 = vcmp.ne.f32.partialorder %v133_v40, 0.0 }
  0x93   :  { %685 = vmatpush1.msk.msra.mxu0 %vm286_vm2, %v261_v7  ;;  %701 = vmatpush1.msk.msra.mxu1 %vm288_vm3, %v259_v5  ;;  %vm140_vm2 = vcmp.ne.f32.partialorder %v129_v43, 0.0  ;;  %vm63_vm3 = vcmp.lt.s32.totalorder %v822_v14, 17 }
  0x94   :  { %v201_v15 = vpop.permute.xlu1 %200  ;;  %529 = vmatprep.subr.mxu0 %v776_v3  ;;  %v199_v16 = vpop.permute.xlu0 %198  ;;  %600 = vmatprep.subr.mxu1 %v771_v2 }
  0x95   :  { %v209_v19 = vsel %vm206_vm4, %v199_v16, %v201_v15  ;;  %530 = vmatpush1.msra.mxu0 %v764_v1  ;;  %601 = vmatpush1.msra.mxu1 %v759_v0 }
  0x96   :  { %686 = vmatprep.subr.msk.mxu0 %vm235_vm5, %v209_v19  ;;  %vm90_vm5 = vcmp.ne.f32.partialorder %v73_v9, 0.0 }
  0x98   :  { %v205_v21 = vpop.permute.xlu1 %204  ;;  %v203_v22 = vpop.permute.xlu0 %202 }
  0x99   :  { %v210_v23 = vsel %vm206_vm4, %v205_v21, %v199_v16  ;;  %v207_v24 = vsel %vm206_vm4, %v203_v22, %v205_v21  ;;  %v208_v25 = vsel %vm206_vm4, %v201_v15, %v203_v22  ;;  %vm91_vm4 = vcmp.ne.f32.partialorder %v77_v46, 0.0 }
  0x9a   :  { %687 = vmatpush1.msk.msra.mxu0 %vm234_vm6, %v210_v23  ;;  %702 = vmatprep.subr.msk.mxu1 %vm237_vm7, %v207_v24  ;;  %vm93_vm6 = vcmp.ne.f32.partialorder %v85_v52, 0.0  ;;  %vm92_vm7 = vcmp.ne.f32.partialorder %v81_v55, 0.0 }
  0x9b   :  { %703 = vmatpush1.msk.msra.mxu1 %vm236_vm8, %v208_v25 }
  0x9c   :  { %v153_v28 = vpop.permute.xlu1 %152  ;;  %v151_v29 = vpop.permute.xlu0 %150 }
  0x9d   :  { %v161_v32 = vsel %vm158_vm9, %v151_v29, %v153_v28 }
  0x9e   :  { %688 = vmatprep.subr.msk.mxu0 %vm187_vm10, %v161_v32 }
  0xa0   :  { %v157_v34 = vpop.permute.xlu1 %156  ;;  %v155_v35 = vpop.permute.xlu0 %154 }
  0xa1   :  { %v162_v36 = vsel %vm158_vm9, %v157_v34, %v151_v29  ;;  %v159_v37 = vsel %vm158_vm9, %v155_v35, %v157_v34  ;;  %v160_v38 = vsel %vm158_vm9, %v153_v28, %v155_v35 }
  0xa2   :  { %689 = vmatpush1.msk.msra.mxu0 %vm186_vm11, %v162_v36  ;;  %704 = vmatprep.subr.msk.mxu1 %vm189_vm12, %v159_v37 }
  0xa3   :  { %705 = vmatpush1.msk.msra.mxu1 %vm188_vm13, %v160_v38 }
  0xa4   :  { %v105_v41 = vpop.permute.xlu1 %104  ;;  %v103_v42 = vpop.permute.xlu0 %102 }
  0xa5   :  { %v113_v45 = vsel %vm110_vm14, %v103_v42, %v105_v41 }
  0xa6   :  { %690 = vmatprep.subr.msk.mxu0 %vm139_vm15, %v113_v45 }
  0xa8   :  { %v109_v47 = vpop.permute.xlu1 %108  ;;  %v107_v48 = vpop.permute.xlu0 %106 }
  0xa9   :  { %v114_v49 = vsel %vm110_vm14, %v109_v47, %v103_v42  ;;  %v111_v50 = vsel %vm110_vm14, %v107_v48, %v109_v47  ;;  %v112_v51 = vsel %vm110_vm14, %v105_v41, %v107_v48 }
  0xaa   :  { %691 = vmatpush1.msk.msra.mxu0 %vm138_vm0, %v114_v49  ;;  %706 = vmatprep.subr.msk.mxu1 %vm141_vm1, %v111_v50 }
  0xab   :  { %707 = vmatpush1.msk.msra.mxu1 %vm140_vm2, %v112_v51 }
  0xac   :  { %v56_v53 = vpop.permute.xlu1 %55  ;;  %v54_v54 = vpop.permute.xlu0 %53 }
  0xad   :  { %v66_v56 = vsel %vm63_vm3, %v54_v54, %v56_v53 }
  0xae   :  { %692 = vmatprep.subr.msk.mxu0 %vm91_vm4, %v66_v56 }
  0xb0   :  { %v60_v57 = vpop.permute.xlu1 %59  ;;  %v58_v58 = vpop.permute.xlu0 %57 }
  0xb1   :  { %v67_v10 = vsel %vm63_vm3, %v60_v57, %v54_v54  ;;  %v64_v12 = vsel %vm63_vm3, %v58_v58, %v60_v57  ;;  %v65_v13 = vsel %vm63_vm3, %v56_v53, %v58_v58 }
  0xb2   :  { %693 = vmatpush1.msk.msra.mxu0 %vm90_vm5, %v67_v10  ;;  %708 = vmatprep.subr.msk.mxu1 %vm93_vm6, %v64_v12 }
  0xb3   :  { %572 = vmatmul.mubr.f32.vlgmr.msra.gmra.mxu0 %v442_v59  ;;  %709 = vmatpush1.msk.msra.mxu1 %vm92_vm7, %v65_v13 }
  0xb4   :  { %643 = vmatmul.mubr.f32.vlgmr.msra.gmra.mxu1 %v442_v59 }
  0xbd   :  { %v657_v61 = vpop.permute.xlu0 %656 }
 0x173   :  { %v573_v60 = vpop.f32.mrf.mxu0 }
 0x174   :  { %v650_v62 = vadd.f32 %v573_v60, %v764_v1  ;;  %v644_v63 = vpop.f32.mrf.mxu1 }
 0x175   :  { %v652_v4 = vadd.f32 %v644_v63, %v759_v0  ;;  %v575_v5 = vpop.f32.mrf.mxu0 }
 0x176   :  { %v651_v6 = vadd.f32 %v575_v5, %v776_v3  ;;  %v646_v7 = vpop.f32.mrf.mxu1  ;;  %v659_v8 = vadd.f32 %v657_v61, %v650_v62 }
 0x177   :  { %v653_v14 = vadd.f32 %v646_v7, %v771_v2  ;;  %v661_v11 = vadd.f32 %v657_v61, %v652_v4 }
 0x178   :  { %v660_v15 = vadd.f32 %v657_v61, %v651_v6  ;;  %663 = vst [vmem:[%s944_s4] sm:$0xff] %v659_v8 }
 0x179   :  { %v662_v16 = vadd.f32 %v657_v61, %v653_v14  ;;  %665 = vst [vmem:[%s944_s4 + $0x10] sm:$0xff] %v661_v11 }
 0x17a   :  { %664 = vst [vmem:[%s944_s4 + $0x8] sm:$0xff] %v660_v15 }
 0x17b   :  { %666 = vst [vmem:[%s944_s4 + $0x18] sm:$0xff] %v662_v16 }

</bundles_post_ra>
